<compile_context>
chip_gen: v7x
topology: tpu7x:2x2x1
jax: 0.10.0
libtpu: 0.0.40
codegen_flags: <defaults>
</compile_context>

<pallas_src>
import functools
import math

import jax
import jax.numpy as jnp
from jax.experimental import pallas as pl
from jax.experimental.pallas import tpu as pltpu


# --------------------------------------------------------------------------- #
# Kernels
# --------------------------------------------------------------------------- #
def _base_node_kernel(dv_ref, v_ref, spike_ref, v_out_ref, *, v_threshold, v_reset):
    """Single-timestep charge -> fire -> reset on one VMEM tile."""
    h = v_ref[...] + dv_ref[...]                        # neuronal_charge (IF-style)
    fired = h >= jnp.asarray(v_threshold, h.dtype)      # neuronal_fire (heaviside)
    spike_ref[...] = fired.astype(spike_ref.dtype)
    # neuronal_reset (v_reset is not None): hard reset to v_reset where fired
    v_out_ref[...] = jnp.where(fired, jnp.asarray(v_reset, h.dtype), h)


def _base_node_multi_step_kernel(dv_ref, v_init_ref, spike_ref, v_out_ref,
                                 *, v_threshold, v_reset):
    """T fused timesteps: membrane state stays resident in the v_out block."""
    @pl.when(pl.program_id(1) == 0)
    def _():
        # Load the initial membrane state once per row tile.
        v_out_ref[...] = v_init_ref[...]

    h = v_out_ref[...] + dv_ref[...]                    # neuronal_charge
    fired = h >= jnp.asarray(v_threshold, h.dtype)      # neuronal_fire
    spike_ref[...] = fired.astype(spike_ref.dtype)
    v_out_ref[...] = jnp.where(fired, jnp.asarray(v_reset, h.dtype), h)   # reset


# --------------------------------------------------------------------------- #
# Layout selection (lane-dense slab, zero-copy when possible)
# --------------------------------------------------------------------------- #
def _choose_layout(E):
    """Return (LANES, rows, rows_pad, TM) for a lane-dense (rows_pad, LANES) slab."""
    # Zero-copy path: split E exactly into (rows, LANES), no pad / slice needed.
    if E % 128 == 0:
        for lanes in (1024, 512, 256, 128):
            if E % lanes != 0:
                continue
            rows = E // lanes
            if rows >= 128:
                # Prefer >= 2 row tiles (v7x megacore) with a reasonably big tile.
                ub = min(512, rows // 2)
                ub -= ub % 8
                for tm in range(ub, 63, -8):            # keep tiles >= 64 sublanes
                    if rows % tm == 0:
                        return lanes, rows, rows, tm
            if rows <= 512:
                # Small / awkward row count: one full-extent block.
                return lanes, rows, rows, rows
    # Padded fallback: lane-dense slab with 512-row tiles.
    lanes = min(1024, 128 * pl.cdiv(E, 128))
    rows = pl.cdiv(E, lanes)
    tm = min(rows, 512)
    rows_pad = tm * pl.cdiv(rows, tm)
    return lanes, rows, rows_pad, tm


def _to_slab(flat, padded, E, rows_pad, lanes):
    if padded != E:
        flat = jnp.pad(flat, (0, padded - E))
    return flat.reshape(rows_pad, lanes)


# --------------------------------------------------------------------------- #
# Single-timestep forward (BaseNode.forward)
# --------------------------------------------------------------------------- #
@functools.partial(jax.jit,
                   static_argnames=("v_threshold", "v_reset", "spike_dtype"),
                   donate_argnames=("v",))
def base_node_forward(dv, v, *, v_threshold=1.0, v_reset=0.0, spike_dtype=None):
    """dv, v: float arrays of identical shape (e.g. NCHW). Returns (spike, v_new)."""
    assert dv.shape == v.shape and dv.dtype == v.dtype
    orig_shape = dv.shape
    dtype = dv.dtype
    sdtype = jnp.dtype(dtype if spike_dtype is None else spike_dtype)
    E = math.prod(orig_shape)

    LANES, rows, rows_pad, TM = _choose_layout(E)
    padded = rows_pad * LANES

    dv2 = _to_slab(dv.reshape(-1), padded, E, rows_pad, LANES)
    v2 = _to_slab(v.reshape(-1), padded, E, rows_pad, LANES)

    kernel = functools.partial(
        _base_node_kernel, v_threshold=float(v_threshold), v_reset=float(v_reset))

    tile = pl.BlockSpec((TM, LANES), lambda i: (i, 0))
    itemsize = jnp.dtype(dtype).itemsize
    cost = pl.CostEstimate(
        flops=3 * padded,
        transcendentals=0,
        bytes_accessed=(3 * itemsize + sdtype.itemsize) * padded)

    spike2, v_new2 = pl.pallas_call(
        kernel,
        out_shape=(
            jax.ShapeDtypeStruct((rows_pad, LANES), sdtype),
            jax.ShapeDtypeStruct((rows_pad, LANES), dtype),
        ),
        grid=(rows_pad // TM,),
        in_specs=[tile, tile],
        out_specs=(tile, tile),
        # v (input 1) is dead after the update; reuse its buffer for v_new (output 1).
        input_output_aliases={1: 1},
        compiler_params=pltpu.CompilerParams(
            dimension_semantics=("parallel",),
            vmem_limit_bytes=32 * 1024 * 1024,
        ),
        cost_estimate=cost,
    )(dv2, v2)

    if padded != E:
        spike = spike2.reshape(-1)[:E].reshape(orig_shape)
        v_new = v_new2.reshape(-1)[:E].reshape(orig_shape)
    else:
        spike = spike2.reshape(orig_shape)
        v_new = v_new2.reshape(orig_shape)
    return spike, v_new


# --------------------------------------------------------------------------- #
# Fused T-timestep forward (SNN loop; membrane state stays in VMEM across T)
# --------------------------------------------------------------------------- #
@functools.partial(jax.jit,
                   static_argnames=("v_threshold", "v_reset", "spike_dtype"),
                   donate_argnames=("v",))
def base_node_multi_step_forward(dv_seq, v, *, v_threshold=1.0, v_reset=0.0,
                                 spike_dtype=None):
    """dv_seq: (T, *neuron_shape); v: (*neuron_shape). Returns (spike_seq, v_final)."""
    T = dv_seq.shape[0]
    neuron_shape = dv_seq.shape[1:]
    assert v.shape == neuron_shape and dv_seq.dtype == v.dtype
    dtype = dv_seq.dtype
    sdtype = jnp.dtype(dtype if spike_dtype is None else spike_dtype)
    E = math.prod(neuron_shape)

    LANES, rows, rows_pad, TM = _choose_layout(E)
    padded = rows_pad * LANES

    dv2 = dv_seq.reshape(T, -1)
    v1 = v.reshape(-1)
    if padded != E:
        dv2 = jnp.pad(dv2, ((0, 0), (0, padded - E)))
        v1 = jnp.pad(v1, (0, padded - E))
    dv3 = dv2.reshape(T, rows_pad, LANES)
    v2 = v1.reshape(rows_pad, LANES)

    kernel = functools.partial(
        _base_node_multi_step_kernel,
        v_threshold=float(v_threshold), v_reset=float(v_reset))

    dv_spec = pl.BlockSpec((None, TM, LANES), lambda i, t: (t, i, 0))
    spike_spec = pl.BlockSpec((None, TM, LANES), lambda i, t: (t, i, 0))
    v_spec = pl.BlockSpec((TM, LANES), lambda i, t: (i, 0))   # resident across t

    itemsize = jnp.dtype(dtype).itemsize
    cost = pl.CostEstimate(
        flops=3 * padded * T,
        transcendentals=0,
        bytes_accessed=(itemsize * (T + 2) + sdtype.itemsize * T) * padded)

    spike3, v_new2 = pl.pallas_call(
        kernel,
        out_shape=(
            jax.ShapeDtypeStruct((T, rows_pad, LANES), sdtype),
            jax.ShapeDtypeStruct((rows_pad, LANES), dtype),
        ),
        grid=(rows_pad // TM, T),
        in_specs=[dv_spec, v_spec],
        out_specs=(spike_spec, v_spec),
        input_output_aliases={1: 1},
        compiler_params=pltpu.CompilerParams(
            dimension_semantics=("parallel", "arbitrary"),
            vmem_limit_bytes=32 * 1024 * 1024,
        ),
        cost_estimate=cost,
    )(dv3, v2)

    if padded != E:
        spike_seq = spike3.reshape(T, -1)[:, :E].reshape((T,) + neuron_shape)
        v_final = v_new2.reshape(-1)[:E].reshape(neuron_shape)
    else:
        spike_seq = spike3.reshape((T,) + neuron_shape)
        v_final = v_new2.reshape(neuron_shape)
    return spike_seq, v_final


# --------------------------------------------------------------------------- #
# Demo / correctness check
# --------------------------------------------------------------------------- #
if __name__ == "__main__":
    key = jax.random.PRNGKey(0)
    k1, k2 = jax.random.split(key)
    N, C, H, W = 2, 4, 16, 16
    v_threshold, v_reset = 1.0, 0.0

    # ---- single-step forward ----
    dv = jax.random.normal(k1, (N, C, H, W), dtype=jnp.float32)
    v0 = jnp.full((N, C, H, W), v_reset, dtype=jnp.float32)

    # Pure-JAX reference (computed BEFORE the call: v0 is donated to the kernel).
    h_ref = v0 + dv
    spike_ref = (h_ref - v_threshold >= 0.0).astype(jnp.float32)
    v_ref_new = (1.0 - spike_ref) * h_ref + spike_ref * v_reset

    spike, v_new = base_node_forward(
        dv, v0, v_threshold=v_threshold, v_reset=v_reset, spike_dtype=jnp.bfloat16)
    jax.block_until_ready((spike, v_new))

    assert spike.dtype == jnp.bfloat16
    assert jnp.allclose(spike.astype(jnp.float32), spike_ref), "spike mismatch"
    assert jnp.allclose(v_new, v_ref_new), "v mismatch"

    # ---- fused multi-timestep forward (T SNN steps, v resident in VMEM) ----
    T = 8
    dv_seq = jax.random.normal(k2, (T, N, C, H, W), dtype=jnp.float32)
    v_init = jnp.full((N, C, H, W), v_reset, dtype=jnp.float32)

    # Pure-JAX reference loop (before the call: v_init is donated).
    v_r = v_init
    spikes_r = []
    for t in range(T):
        h_t = v_r + dv_seq[t]
        s_t = (h_t - v_threshold >= 0.0).astype(jnp.float32)
        v_r = (1.0 - s_t) * h_t + s_t * v_reset
        spikes_r.append(s_t)
    spikes_r = jnp.stack(spikes_r)

    spike_seq, v_final = base_node_multi_step_forward(
        dv_seq, v_init, v_threshold=v_threshold, v_reset=v_reset,
        spike_dtype=jnp.bfloat16)
    jax.block_until_ready((spike_seq, v_final))

    assert jnp.allclose(spike_seq.astype(jnp.float32), spikes_r), "multi-step spike mismatch"
    assert jnp.allclose(v_final, v_r), "multi-step v mismatch"

    print("KERNEL_OK")
</pallas_src>

<mosaic_0001>
module attributes {stable_mosaic.version = 11 : i64} {
  func.func @_base_node_kernel(%arg0: i32, %arg1: memref<2x1024xf32, #tpu.memory_space<vmem>>, %arg2: memref<2x1024xf32, #tpu.memory_space<vmem>>, %arg3: memref<2x1024xbf16, #tpu.memory_space<vmem>>, %arg4: memref<2x1024xf32, #tpu.memory_space<vmem>>) attributes {dimension_semantics = [#tpu.dimension_semantics<parallel>], iteration_bounds = array<i64: 1>, scalar_prefetch = 0 : i64, scratch_operands = 0 : i64, tpu.core_type = #tpu.core_type<tc>, window_params = [{transform_indices = @transform_0, window_bounds = array<i64: 2, 1024>}, {transform_indices = @transform_1, window_bounds = array<i64: 2, 1024>}, {transform_indices = @transform_2, window_bounds = array<i64: 2, 1024>}, {transform_indices = @transform_3, window_bounds = array<i64: 2, 1024>}]} {
    %c0 = arith.constant 0 : index
    %c0_0 = arith.constant 0 : index
    %0 = vector.load %arg2[%c0, %c0_0] : memref<2x1024xf32, #tpu.memory_space<vmem>>, vector<2x1024xf32>
    %c0_1 = arith.constant 0 : index
    %c0_2 = arith.constant 0 : index
    %1 = vector.load %arg1[%c0_1, %c0_2] : memref<2x1024xf32, #tpu.memory_space<vmem>>, vector<2x1024xf32>
    %2 = arith.addf %0, %1 : vector<2x1024xf32>
    %cst = arith.constant 1.000000e+00 : f32
    %3 = vector.broadcast %cst : f32 to vector<2x1024xf32>
    %4 = arith.cmpf oge, %2, %3 : vector<2x1024xf32>
    %5 = arith.extui %4 : vector<2x1024xi1> to vector<2x1024xi32>
    %6 = arith.sitofp %5 : vector<2x1024xi32> to vector<2x1024xf32>
    %7 = arith.truncf %6 : vector<2x1024xf32> to vector<2x1024xbf16>
    %c0_3 = arith.constant 0 : index
    %c0_4 = arith.constant 0 : index
    %8 = vector.load %arg3[%c0_3, %c0_4] : memref<2x1024xbf16, #tpu.memory_space<vmem>>, vector<2x1024xbf16>
    tpu.vector_store %arg3[%c0_3, %c0_4], %7 {strides = array<i32>} : memref<2x1024xbf16, #tpu.memory_space<vmem>>, vector<2x1024xbf16>,
    %cst_5 = arith.constant 0.000000e+00 : f32
    %9 = vector.broadcast %cst_5 : f32 to vector<2x1024xf32>
    %10 = arith.select %4, %9, %2 : vector<2x1024xi1>, vector<2x1024xf32>
    %c0_6 = arith.constant 0 : index
    %c0_7 = arith.constant 0 : index
    %11 = vector.load %arg4[%c0_6, %c0_7] : memref<2x1024xf32, #tpu.memory_space<vmem>>, vector<2x1024xf32>
    tpu.vector_store %arg4[%c0_6, %c0_7], %10 {strides = array<i32>} : memref<2x1024xf32, #tpu.memory_space<vmem>>, vector<2x1024xf32>,
    return
  }
  func.func @transform_0(%arg0: i32) -> (i32, i32) {
    %c0_i32 = arith.constant 0 : i32
    %c0_i32_0 = arith.constant 0 : i32
    return %arg0, %c0_i32 : i32, i32
  }
  func.func @transform_1(%arg0: i32) -> (i32, i32) {
    %c0_i32 = arith.constant 0 : i32
    %c0_i32_0 = arith.constant 0 : i32
    return %arg0, %c0_i32 : i32, i32
  }
  func.func @transform_2(%arg0: i32) -> (i32, i32) {
    %c0_i32 = arith.constant 0 : i32
    %c0_i32_0 = arith.constant 0 : i32
    return %arg0, %c0_i32 : i32, i32
  }
  func.func @transform_3(%arg0: i32) -> (i32, i32) {
    %c0_i32 = arith.constant 0 : i32
    %c0_i32_0 = arith.constant 0 : i32
    return %arg0, %c0_i32 : i32, i32
  }
}

</mosaic_0001>

<bundles_post_ra>
// kernel: base_node_forward.1
= control target key start
LH: loop header
LB: loop body
LE: loop exit
PB: predicated region body
PF: predicated region fallthrough
CT: control target
= control target key end

     0   :  { %v31_v0 = vlaneseq  ;;  %v157_v4 = vmov 1983009808   ;;  %v158_v6 = vmov 1966171168   ;;  %v159_v13 = vmov 0.0   ;;  %s201_s0 = inlined_call_operand.vmem [shape: f32[2,1024], index: 0, kind: input, shape index: {}]   ;;  %s202_s1 = inlined_call_operand.vmem [shape: f32[2,1024], index: 1, kind: input, shape index: {}, may-alias: {1,3}]   ;;  %s203_s3 = inlined_call_operand.vmem [shape: f32[2,1024], index: 3, kind: output, shape index: {1}, may-alias: {1,3}]   ;;  %s204_s2 = inlined_call_operand.vmem [shape: bf16[2,1024], index: 2, kind: output, shape index: {0}]  }
   0x1   :  { %v13_v1 = vld [vmem:[%s202_s1] sm:$0xff]  ;;  %v14_v2 = vld [vmem:[%s202_s1 + $0x8] sm:$0xff]  ;;  %v29_v5 = vunpack.c.l.s4 %v157_v4  ;;  %v90_v7 = vunpack.c.l.s4 %v158_v6 }
   0x2   :  { %v15_v3 = vld [vmem:[%s201_s0] sm:$0xff]  ;;  %v16_v8 = vld [vmem:[%s201_s0 + $0x8] sm:$0xff]  ;;  %v32_v10 = vshrl.u32 %v31_v0, 7 }
   0x3   :  { %v17_v9 = vadd.f32 %v15_v3, %v13_v1  ;;  %v18_v11 = vadd.f32 %v16_v8, %v14_v2  ;;  %v30_v12 = vunpack.c.0.s8 %v29_v5  ;;  %v91_v16 = vunpack.c.0.s8 %v90_v7 }
   0x5   :  { %vm19_vm0 = vcmp.ge.f32.partialorder %v17_v9, 1.0  ;;  %vm20_vm1 = vcmp.ge.f32.partialorder %v18_v11, 1.0  ;;  %v33_v15 = vsub.s32 %v30_v12, %v32_v10  ;;  %v94_v28 = vsub.s32 %v91_v16, %v32_v10 }
   0x6   :  { %v148_v14 = vsel %vm19_vm0, 1.0, %v159_v13  ;;  %v149_v17 = vsel %vm20_vm1, 1.0, %v159_v13  ;;  %v136_v19 = vsel %vm19_vm0, 0.0, %v17_v9  ;;  %v137_v20 = vsel %vm20_vm1, 0.0, %v18_v11 }
   0x7   :  { %v27_v18 = vcombine.high %v148_v14, %v148_v14  ;;  %v34_v21 = vrot.slane %v148_v14, %v33_v15  ;;  %v44_v22 = vcombine.high %v149_v17, %v149_v17  ;;  %v51_v23 = vrot.slane %v149_v17, %v33_v15  ;;  %138 = vst [vmem:[%s203_s3] sm:$0xff] %v136_v19 }
   0x8   :  { %139 = vst [vmem:[%s203_s3 + $0x8] sm:$0xff] %v137_v20 }
   0x9   :  { %v41_v24 = vrot.slane %v27_v18, %v33_v15  ;;  %v42_v25 = vcombine.high %v34_v21, %v34_v21  ;;  %v58_v26 = vrot.slane %v44_v22, %v33_v15  ;;  %v59_v27 = vcombine.high %v51_v23, %v51_v23 }
   0xb   :  { %v43_v29 = vcombine.high %v41_v24, %v41_v24  ;;  %v60_v30 = vcombine.high %v58_v26, %v58_v26  ;;  %v150_v31 = vpack.c.bf16 %v42_v25, %v34_v21  ;;  %v152_v32 = vpack.c.bf16 %v59_v27, %v51_v23 }
   0xd   :  { %v151_v33 = vpack.c.bf16 %v43_v29, %v41_v24  ;;  %v153_v34 = vpack.c.bf16 %v60_v30, %v58_v26  ;;  %v95_v35 = vrot.slane %v150_v31, %v94_v28  ;;  %v109_v36 = vrot.slane %v152_v32, %v94_v28 }
   0xf   :  { %v102_v37 = vrot.slane %v151_v33, %v94_v28  ;;  %v116_v38 = vrot.slane %v153_v34, %v94_v28 }
  0x11   :  { %v117_v39 = vcombine.low %v95_v35, %v102_v37  ;;  %v118_v40 = vcombine.low %v109_v36, %v116_v38 }
  0x13   :  { %v125_v41 = vrot.slane %v117_v39, %v94_v28  ;;  %v132_v42 = vrot.slane %v118_v40, %v94_v28 }
  0x15   :  { %v133_v43 = vcombine.low %v125_v41, %v132_v42 }
  0x17   :  { %135 = vst [vmem:[%s204_s2] sm:$0xff] %v133_v43 }

</bundles_post_ra>
